<compile_context>
chip_gen: v5e
topology: v5e:2x2
jax: 0.10.0
libtpu: 0.0.40
codegen_flags: <defaults>
</compile_context>

<pallas_src>
import math
from functools import partial

import jax
import jax.numpy as jnp
from jax.experimental import pallas as pl
from jax.experimental.pallas import tpu as pltpu

_VMEM = pl.BlockSpec(memory_space=pltpu.MemorySpace.VMEM)


# --------------------------------------------------------------------------
# Fused Pallas kernel: GRU stack (one time step) + mu/sigma heads
# --------------------------------------------------------------------------
def _rnn_mean_var_kernel(x_ref, h0_ref, w_ref, b_ref, hw_ref, hb_ref, slab_ref):
    """One GRU time step over all layers + fused mu/sigma head.

    x_ref   : (B, in0)            f32   layer-0 input
    h0_ref  : (L, B, H)           f32   previous hidden state
    w_ref   : (L, kpad+H, 4H)     bf16  packed gate weights:
                                        cols [0:2H]  = W_ir|W_iz over W_hr|W_hz
                                        cols [2H:3H] = W_in, cols [3H:4H] = W_hn
    b_ref   : (L, 1, 4H)          f32   packed gate biases
    hw_ref  : (H, head_cols)      bf16  [h2n_w | h2v_w | 0 pad]
    hb_ref  : (1, head_cols)      f32   [h2n_b | h2v_b | 0 pad]
    slab_ref: (B, L*H+head_cols)  f32   [h_0 | .. | h_{L-1} | mu | sigma | 0]
    """
    L, B, H = h0_ref.shape
    in0 = x_ref.shape[-1]
    kpad = w_ref.shape[1] - H          # padded "input" width = max(in0, H)

    inp = x_ref[...]                   # (B, in0)
    if in0 < kpad:                     # pad lanes only ever hit zero weight rows
        inp = jnp.concatenate(
            [inp, jnp.zeros((B, kpad - in0), jnp.float32)], axis=1)

    hs = []
    for l in range(L):                 # static unroll over layers
        h_prev = h0_ref[l]             # (B, H)
        # Assemble [x | h_prev] in vregs (no VMEM scratch round trip).
        xh = jnp.concatenate([inp, h_prev], axis=1)          # (B, kpad+H)
        # Single MXU push per cell: bf16 operands, f32 accumulate.
        g = jnp.dot(xh.astype(jnp.bfloat16), w_ref[l],
                    preferred_element_type=jnp.float32) + b_ref[l]
        rz = jax.nn.sigmoid(g[:, :2 * H])   # r/z: input+hidden already summed
        r = rz[:, :H]
        z = rz[:, H:]
        n = jnp.tanh(g[:, 2 * H:3 * H] + r * g[:, 3 * H:])
        h_new = n + z * (h_prev - n)        # == (1-z)*n + z*h_prev, 3 VPU ops
        hs.append(h_new)
        if l + 1 < L:
            if H < kpad:
                inp = jnp.concatenate(
                    [h_new, jnp.zeros((B, kpad - H), jnp.float32)], axis=1)
            else:
                inp = h_new

    # Fused mu/sigma head; its output columns already sit at their final
    # slab lanes (zero-padded so the full slab is a multiple of 128 lanes).
    # (Raw linear output for sigma -- matches the PyTorch module.)
    ms = jnp.dot(hs[-1].astype(jnp.bfloat16), hw_ref[...],
                 preferred_element_type=jnp.float32) + hb_ref[...]

    # Single lane-dense store of the whole result slab.
    slab_ref[...] = jnp.concatenate(hs + [ms], axis=1)


# --------------------------------------------------------------------------
# pallas_call wrapper (no grid, everything VMEM-resident) + slab splitting
# --------------------------------------------------------------------------
@partial(jax.jit, static_argnames=("output_size",))
def _fused_forward(x, h0, w_packed, b_packed, head_w, head_b, *, output_size):
    B = x.shape[0]
    L, _, H = h0.shape
    head_cols = head_w.shape[1]
    slab_w = L * H + head_cols

    slab = pl.pallas_call(
        _rnn_mean_var_kernel,
        out_shape=jax.ShapeDtypeStruct((B, slab_w), jnp.float32),
        in_specs=[_VMEM] * 6,
        out_specs=_VMEM,
    )(x[:, 0, :], h0, w_packed, b_packed, head_w, head_b)

    lh = L * H
    h_new = slab[:, :lh].reshape(B, L, H).transpose(1, 0, 2)     # (L, B, H)
    mu = slab[:, lh:lh + output_size]
    sig = slab[:, lh + output_size:lh + 2 * output_size]
    return mu, sig, h_new


def rnn_mean_var_forward(params, x, hidden):
    """Mirrors RnnMeanVar.forward: returns (mu, sigma, new_hidden)."""
    B, S, _ = x.shape
    assert S == 1, "h_out.view(batch,-1) into Linear(hidden,...) implies seq_len == 1"
    mu, sig, h_new = _fused_forward(
        x, hidden, params["w_packed"], params["b_packed"],
        params["head_w"], params["head_b"],
        output_size=params["output_size"])
    if params["output_size"] == 1:           # torch .squeeze(1)
        mu, sig = mu[:, 0], sig[:, 0]
    return mu, sig, h_new


# --------------------------------------------------------------------------
# Parameter init (mirrors PyTorch defaults) + weight packing for the kernel
# --------------------------------------------------------------------------
def _uniform(key, shape, scale):
    return jax.random.uniform(key, shape, jnp.float32, -scale, scale)


def _round_up(v, m):
    return ((v + m - 1) // m) * m


def _pack_gru_layer(w_ih, w_hh, b_ih, b_hh, kpad):
    """Pack one layer into (kpad+H, 4H) weight / (1, 4H) bias.

    Columns: [ r,z (input rows + hidden rows -> summed by the matmul) |
               n input part | n hidden part ].
    """
    in_sz, h3 = w_ih.shape
    h = h3 // 3
    w = jnp.zeros((kpad + h, 4 * h), jnp.float32)
    w = w.at[:in_sz, :2 * h].set(w_ih[:, :2 * h])
    w = w.at[:in_sz, 2 * h:3 * h].set(w_ih[:, 2 * h:])
    w = w.at[kpad:, :2 * h].set(w_hh[:, :2 * h])
    w = w.at[kpad:, 3 * h:].set(w_hh[:, 2 * h:])
    b = jnp.concatenate(
        [b_ih[:, :2 * h] + b_hh[:, :2 * h], b_ih[:, 2 * h:], b_hh[:, 2 * h:]],
        axis=1)
    return w, b


def init_params(key, input_size, hidden_size, output_size, n_layers):
    assert n_layers >= 1, "RnnMeanVar needs at least one GRU layer"
    kh = 1.0 / math.sqrt(hidden_size)
    params = {"input_size": input_size, "hidden_size": hidden_size,
              "output_size": output_size, "n_layers": n_layers}

    layers = []
    for l in range(n_layers):
        in_sz = input_size if l == 0 else hidden_size
        key, k1, k2, k3, k4 = jax.random.split(key, 5)
        layers.append((
            _uniform(k1, (in_sz, 3 * hidden_size), kh),        # w_ih^T
            _uniform(k2, (hidden_size, 3 * hidden_size), kh),  # w_hh^T
            _uniform(k3, (1, 3 * hidden_size), kh),            # b_ih
            _uniform(k4, (1, 3 * hidden_size), kh),            # b_hh
        ))
    params["layers"] = layers

    kpad = max(input_size, hidden_size)
    packed = [_pack_gru_layer(*lyr, kpad) for lyr in layers]
    # bf16 MXU operands (f32 accumulation happens in-kernel).
    params["w_packed"] = jnp.stack([p[0] for p in packed], 0).astype(jnp.bfloat16)
    params["b_packed"] = jnp.stack([p[1] for p in packed], 0)   # (L, 1, 4H) f32

    key, k1, k2, k3, k4 = jax.random.split(key, 5)
    w_n = _uniform(k1, (hidden_size, output_size), kh)   # h2n
    b_n = _uniform(k2, (1, output_size), kh)
    w_v = _uniform(k3, (hidden_size, output_size), kh)   # h2v
    b_v = _uniform(k4, (1, output_size), kh)
    params["h2n_w"], params["h2n_b"] = w_n, b_n
    params["h2v_w"], params["h2v_b"] = w_v, b_v

    # Lane-dense slab: [L*H hidden lanes | mu | sigma | 0 pad] -> mult. of 128.
    slab_w = _round_up(n_layers * hidden_size + 2 * output_size, 128)
    head_cols = slab_w - n_layers * hidden_size
    hw = jnp.zeros((hidden_size, head_cols), jnp.float32)
    hw = hw.at[:, :output_size].set(w_n)
    hw = hw.at[:, output_size:2 * output_size].set(w_v)
    hb = jnp.zeros((1, head_cols), jnp.float32)
    hb = hb.at[:, :output_size].set(b_n)
    hb = hb.at[:, output_size:2 * output_size].set(b_v)
    params["head_w"] = hw.astype(jnp.bfloat16)   # (H, head_cols)
    params["head_b"] = hb                        # (1, head_cols) f32
    return params


# --------------------------------------------------------------------------
# Pure-JAX reference (f32, correctness check only)
# --------------------------------------------------------------------------
def _ref_gru_cell(x, h, w_ih, w_hh, b_ih, b_hh):
    H = h.shape[-1]
    gi = x @ w_ih + b_ih
    gh = h @ w_hh + b_hh
    r = jax.nn.sigmoid(gi[:, :H] + gh[:, :H])
    z = jax.nn.sigmoid(gi[:, H:2 * H] + gh[:, H:2 * H])
    n = jnp.tanh(gi[:, 2 * H:] + r * gh[:, 2 * H:])
    return (1.0 - z) * n + z * h


def reference_forward(params, x, hidden):
    inp = x[:, 0, :]
    hs = []
    for l, (w_ih, w_hh, b_ih, b_hh) in enumerate(params["layers"]):
        h_new = _ref_gru_cell(inp, hidden[l], w_ih, w_hh, b_ih, b_hh)
        hs.append(h_new)
        inp = h_new
    mu = inp @ params["h2n_w"] + params["h2n_b"]
    sig = inp @ params["h2v_w"] + params["h2v_b"]
    if params["output_size"] == 1:
        mu, sig = mu[:, 0], sig[:, 0]
    return mu, sig, jnp.stack(hs, 0)


# --------------------------------------------------------------------------
if __name__ == "__main__":
    BATCH, SEQ, INPUT, HIDDEN, OUTPUT, N_LAYERS = 8, 1, 16, 32, 3, 2

    key = jax.random.PRNGKey(0)
    kp, kx, kh = jax.random.split(key, 3)
    params = init_params(kp, INPUT, HIDDEN, OUTPUT, N_LAYERS)

    x = jax.random.normal(kx, (BATCH, SEQ, INPUT), jnp.float32)
    hidden = jax.random.normal(kh, (N_LAYERS, BATCH, HIDDEN), jnp.float32)

    mu, sigma, h_new = rnn_mean_var_forward(params, x, hidden)
    jax.block_until_ready((mu, sigma, h_new))

    mu_r, sig_r, h_r = reference_forward(params, x, hidden)

    assert mu.shape == (BATCH, OUTPUT) and sigma.shape == (BATCH, OUTPUT)
    assert h_new.shape == (N_LAYERS, BATCH, HIDDEN)
    # Tolerance loosened (vs f32 reference) because the MXU operands are bf16;
    # values are O(1) and observed error is ~1e-2 absolute.
    assert jnp.allclose(mu, mu_r, atol=5e-2, rtol=5e-2)
    assert jnp.allclose(sigma, sig_r, atol=5e-2, rtol=5e-2)
    assert jnp.allclose(h_new, h_r, atol=5e-2, rtol=5e-2)

    print("KERNEL_OK")
</pallas_src>

<mosaic_0001>
module attributes {stable_mosaic.version = 11 : i64} {
  func.func @_rnn_mean_var_kernel(%arg0: memref<8x16xf32, #tpu.memory_space<vmem>>, %arg1: memref<2x8x32xf32, #tpu.memory_space<vmem>>, %arg2: memref<2x64x128xbf16, #tpu.memory_space<vmem>>, %arg3: memref<2x1x128xf32, #tpu.memory_space<vmem>>, %arg4: memref<32x64xbf16, #tpu.memory_space<vmem>>, %arg5: memref<1x64xf32, #tpu.memory_space<vmem>>, %arg6: memref<8x128xf32, #tpu.memory_space<vmem>>) attributes {dimension_semantics = [], scalar_prefetch = 0 : i64, scratch_operands = 0 : i64, tpu.core_type = #tpu.core_type<tc>} {
    %c0 = arith.constant 0 : index
    %c0_0 = arith.constant 0 : index
    %0 = vector.load %arg0[%c0, %c0_0] : memref<8x16xf32, #tpu.memory_space<vmem>>, vector<8x16xf32>
    %cst = arith.constant 0.000000e+00 : f32
    %1 = vector.broadcast %cst : f32 to vector<8x16xf32>
    %2 = tpu.concatenate %0, %1 in 1 : vector<8x16xf32>, vector<8x16xf32> -> vector<8x32xf32>
    %c0_1 = arith.constant 0 : index
    %c0_2 = arith.constant 0 : index
    %c0_3 = arith.constant 0 : index
    %3 = vector.load %arg1[%c0_1, %c0_2, %c0_3] : memref<2x8x32xf32, #tpu.memory_space<vmem>>, vector<1x8x32xf32>
    %4 = vector.shape_cast %3 : vector<1x8x32xf32> to vector<8x32xf32>
    %5 = tpu.concatenate %2, %4 in 1 : vector<8x32xf32>, vector<8x32xf32> -> vector<8x64xf32>
    %6 = arith.truncf %5 : vector<8x64xf32> to vector<8x64xbf16>
    %c0_4 = arith.constant 0 : index
    %c0_5 = arith.constant 0 : index
    %c0_6 = arith.constant 0 : index
    %7 = vector.load %arg2[%c0_4, %c0_5, %c0_6] : memref<2x64x128xbf16, #tpu.memory_space<vmem>>, vector<1x64x128xbf16>
    %8 = vector.shape_cast %7 : vector<1x64x128xbf16> to vector<64x128xbf16>
    %cst_7 = arith.constant dense<0.000000e+00> : vector<8x128xf32>
    %9 = tpu.matmul %6, %8, %cst_7 {dimension_numbers = #tpu.dot_dimension_numbers<[1], [0], [0], [1], [0, 0, 1, 1], [], []>} : vector<8x64xbf16>, vector<64x128xbf16>, vector<8x128xf32> -> vector<8x128xf32>
    %c0_8 = arith.constant 0 : index
    %c0_9 = arith.constant 0 : index
    %c0_10 = arith.constant 0 : index
    %10 = vector.load %arg3[%c0_8, %c0_9, %c0_10] : memref<2x1x128xf32, #tpu.memory_space<vmem>>, vector<1x1x128xf32>
    %11 = vector.shape_cast %10 : vector<1x1x128xf32> to vector<1x128xf32>
    %12 = vector.broadcast %11 : vector<1x128xf32> to vector<8x128xf32>
    %13 = arith.addf %9, %12 : vector<8x128xf32>
    %14 = vector.extract_strided_slice %13 {offsets = [0, 0], sizes = [8, 64], strides = [1, 1]} : vector<8x128xf32> to vector<8x64xf32>
    %15 = arith.negf %14 : vector<8x64xf32>
    %16 = math.exp %15 : vector<8x64xf32>
    %cst_11 = arith.constant 1.000000e+00 : f32
    %17 = vector.broadcast %cst_11 : f32 to vector<8x64xf32>
    %18 = arith.addf %17, %16 : vector<8x64xf32>
    %19 = arith.divf %17, %18 : vector<8x64xf32>
    %20 = vector.extract_strided_slice %19 {offsets = [0, 0], sizes = [8, 32], strides = [1, 1]} : vector<8x64xf32> to vector<8x32xf32>
    %21 = vector.extract_strided_slice %19 {offsets = [0, 32], sizes = [8, 32], strides = [1, 1]} : vector<8x64xf32> to vector<8x32xf32>
    %22 = vector.extract_strided_slice %13 {offsets = [0, 64], sizes = [8, 32], strides = [1, 1]} : vector<8x128xf32> to vector<8x32xf32>
    %23 = vector.extract_strided_slice %13 {offsets = [0, 96], sizes = [8, 32], strides = [1, 1]} : vector<8x128xf32> to vector<8x32xf32>
    %24 = arith.mulf %20, %23 : vector<8x32xf32>
    %25 = arith.addf %22, %24 : vector<8x32xf32>
    %26 = math.tanh %25 : vector<8x32xf32>
    %27 = arith.subf %4, %26 : vector<8x32xf32>
    %28 = arith.mulf %21, %27 : vector<8x32xf32>
    %29 = arith.addf %26, %28 : vector<8x32xf32>
    %c1 = arith.constant 1 : index
    %c0_12 = arith.constant 0 : index
    %c0_13 = arith.constant 0 : index
    %30 = vector.load %arg1[%c1, %c0_12, %c0_13] : memref<2x8x32xf32, #tpu.memory_space<vmem>>, vector<1x8x32xf32>
    %31 = vector.shape_cast %30 : vector<1x8x32xf32> to vector<8x32xf32>
    %32 = tpu.concatenate %29, %31 in 1 : vector<8x32xf32>, vector<8x32xf32> -> vector<8x64xf32>
    %33 = arith.truncf %32 : vector<8x64xf32> to vector<8x64xbf16>
    %c1_14 = arith.constant 1 : index
    %c0_15 = arith.constant 0 : index
    %c0_16 = arith.constant 0 : index
    %34 = vector.load %arg2[%c1_14, %c0_15, %c0_16] : memref<2x64x128xbf16, #tpu.memory_space<vmem>>, vector<1x64x128xbf16>
    %35 = vector.shape_cast %34 : vector<1x64x128xbf16> to vector<64x128xbf16>
    %cst_17 = arith.constant dense<0.000000e+00> : vector<8x128xf32>
    %36 = tpu.matmul %33, %35, %cst_17 {dimension_numbers = #tpu.dot_dimension_numbers<[1], [0], [0], [1], [0, 0, 1, 1], [], []>} : vector<8x64xbf16>, vector<64x128xbf16>, vector<8x128xf32> -> vector<8x128xf32>
    %c1_18 = arith.constant 1 : index
    %c0_19 = arith.constant 0 : index
    %c0_20 = arith.constant 0 : index
    %37 = vector.load %arg3[%c1_18, %c0_19, %c0_20] : memref<2x1x128xf32, #tpu.memory_space<vmem>>, vector<1x1x128xf32>
    %38 = vector.shape_cast %37 : vector<1x1x128xf32> to vector<1x128xf32>
    %39 = vector.broadcast %38 : vector<1x128xf32> to vector<8x128xf32>
    %40 = arith.addf %36, %39 : vector<8x128xf32>
    %41 = vector.extract_strided_slice %40 {offsets = [0, 0], sizes = [8, 64], strides = [1, 1]} : vector<8x128xf32> to vector<8x64xf32>
    %42 = arith.negf %41 : vector<8x64xf32>
    %43 = math.exp %42 : vector<8x64xf32>
    %cst_21 = arith.constant 1.000000e+00 : f32
    %44 = vector.broadcast %cst_21 : f32 to vector<8x64xf32>
    %45 = arith.addf %44, %43 : vector<8x64xf32>
    %46 = arith.divf %44, %45 : vector<8x64xf32>
    %47 = vector.extract_strided_slice %46 {offsets = [0, 0], sizes = [8, 32], strides = [1, 1]} : vector<8x64xf32> to vector<8x32xf32>
    %48 = vector.extract_strided_slice %46 {offsets = [0, 32], sizes = [8, 32], strides = [1, 1]} : vector<8x64xf32> to vector<8x32xf32>
    %49 = vector.extract_strided_slice %40 {offsets = [0, 64], sizes = [8, 32], strides = [1, 1]} : vector<8x128xf32> to vector<8x32xf32>
    %50 = vector.extract_strided_slice %40 {offsets = [0, 96], sizes = [8, 32], strides = [1, 1]} : vector<8x128xf32> to vector<8x32xf32>
    %51 = arith.mulf %47, %50 : vector<8x32xf32>
    %52 = arith.addf %49, %51 : vector<8x32xf32>
    %53 = math.tanh %52 : vector<8x32xf32>
    %54 = arith.subf %31, %53 : vector<8x32xf32>
    %55 = arith.mulf %48, %54 : vector<8x32xf32>
    %56 = arith.addf %53, %55 : vector<8x32xf32>
    %57 = arith.truncf %56 : vector<8x32xf32> to vector<8x32xbf16>
    %c0_22 = arith.constant 0 : index
    %c0_23 = arith.constant 0 : index
    %58 = vector.load %arg4[%c0_22, %c0_23] : memref<32x64xbf16, #tpu.memory_space<vmem>>, vector<32x64xbf16>
    %cst_24 = arith.constant dense<0.000000e+00> : vector<8x64xf32>
    %59 = tpu.matmul %57, %58, %cst_24 {dimension_numbers = #tpu.dot_dimension_numbers<[1], [0], [0], [1], [0, 0, 1, 1], [], []>} : vector<8x32xbf16>, vector<32x64xbf16>, vector<8x64xf32> -> vector<8x64xf32>
    %c0_25 = arith.constant 0 : index
    %c0_26 = arith.constant 0 : index
    %60 = vector.load %arg5[%c0_25, %c0_26] : memref<1x64xf32, #tpu.memory_space<vmem>>, vector<1x64xf32>
    %61 = vector.broadcast %60 : vector<1x64xf32> to vector<8x64xf32>
    %62 = arith.addf %59, %61 : vector<8x64xf32>
    %63 = tpu.concatenate %29, %56, %62 in 1 : vector<8x32xf32>, vector<8x32xf32>, vector<8x64xf32> -> vector<8x128xf32>
    %c0_27 = arith.constant 0 : index
    %c0_28 = arith.constant 0 : index
    %64 = vector.load %arg6[%c0_27, %c0_28] : memref<8x128xf32, #tpu.memory_space<vmem>>, vector<8x128xf32>
    tpu.vector_store %arg6[%c0_27, %c0_28], %63 {strides = array<i32>} : memref<8x128xf32, #tpu.memory_space<vmem>>, vector<8x128xf32>,
    return
  }
}

</mosaic_0001>

<bundles_post_ra>
// kernel: _fused_forward.1
= control target key start
LH: loop header
LB: loop body
LE: loop exit
PB: predicated region body
PF: predicated region fallthrough
CT: control target
= control target key end

     0   :  { %11 = vsyncpa [#allocation3], 0  ;;  %s641_s0 = inlined_call_operand.hbm [shape: f32[8,16], index: 0, kind: input, shape index: {}]   ;;  %s642_s1 = inlined_call_operand.hbm [shape: f32[2,8,32], index: 1, kind: input, shape index: {}]   ;;  %s643_s2 = inlined_call_operand.hbm [shape: bf16[2,64,128], index: 2, kind: input, shape index: {}]   ;;  %s644_s3 = inlined_call_operand.vmem [shape: f32[2,1,128], index: 3, kind: input, shape index: {}]   ;;  %s645_s4 = inlined_call_operand.hbm [shape: bf16[32,64], index: 4, kind: input, shape index: {}]   ;;  %s646_s5 = inlined_call_operand.vmem [shape: f32[1,64], index: 5, kind: input, shape index: {}]   ;;  %s647_s6 = inlined_call_operand.vmem [shape: f32[8,128], index: 6, kind: output, shape index: {}]  }
   0x1   :  { %12 = vsyncpa [#allocation5], 0  ;;  %s29_s23 = sshll.u32 %s642_s1, 4  ;;  %s30_s23 = int_to_ptr.hbm [resolvable:$true] %s29_s23 }
   0x2   :  { %13 = vsyncpa [#allocation8], 0  ;;  %s546_s24 = smov [#allocation4]   ;;  %s19_s28 = sshll.u32 %s641_s0, 4  ;;  %s20_s28 = int_to_ptr.hbm [resolvable:$true] %s19_s28 }
   0x3   :  { %s31_s25 = sshll.u32 %s546_s24, 4  ;;  %s547_s29 = smov 128   ;;  %s32_s25 = int_to_ptr.vmem [resolvable:$true] %s31_s25 }
   0x4   :  { %s548_s30 = smov 8   ;;  %s549_s7 = smov [#allocation2]  }
   0x5   :  { %37 = dma.hbm_to_vmem [thread:$0]  %s30_s23, 256, %s32_s25, [#allocation5], %s547_s29, %s547_s29, %s548_s30  }
   0x6   :  { %s21_s8 = sshll.u32 %s549_s7, 4  ;;  %s42_s11 = sshll.u32 %s643_s2, 4  ;;  %s22_s8 = int_to_ptr.vmem [resolvable:$true] %s21_s8  ;;  %s43_s11 = int_to_ptr.hbm [resolvable:$true] %s42_s11 }
   0x7   :  { %24 = dma.hbm_to_vmem [thread:$0]  %s20_s28, 128, %s22_s8, [#allocation3]  }
   0x8   :  { %s550_s1 = smov [#allocation6]   ;;  %s57_s0 = sshll.u32 %s645_s4, 4  ;;  %s58_s0 = int_to_ptr.hbm [resolvable:$true] %s57_s0 }
   0x9   :  { %s44_s12 = sshll.u32 %s550_s1, 4  ;;  %s551_s15 = smov 64   ;;  %s45_s12 = int_to_ptr.vmem [resolvable:$true] %s44_s12 }
   0xa   :  { %s552_s16 = smov 4   ;;  %s553_s17 = smov [#allocation7]  }
   0xb   :  { %50 = dma.hbm_to_vmem [thread:$0]  %s43_s11, 1024, %s45_s12, [#allocation5], %s551_s15, %s551_s15, %s552_s16  }
   0xc   :  { %s59_s18 = sshll.u32 %s553_s17, 4  ;;  %s60_s18 = int_to_ptr.vmem [resolvable:$true] %s59_s18 }
   0xd   :  { %65 = dma.hbm_to_vmem [thread:$0]  %s58_s0, 256, %s60_s18, [#allocation8], %s551_s15, %s551_s15, %s552_s16  }
   0xe   :  { %540 = dma.done.wait [#allocation3], 128  }
   0xf   :  { %541 = vsyncadd [#allocation3], 4294967168 }
  0x10   :  { %542 = dma.done.wait [#allocation5], 1280  }
  0x11   :  { %543 = vsyncadd [#allocation5], 4294966016 }
  0x12   :  { %544 = dma.done.wait [#allocation8], 256  }
  0x13   :  { %545 = vsyncadd [#allocation8], 4294967040  ;;  %v88_v0 = vld [vmem:[#allocation4] sm:$0xff]  ;;  %v412_v1 = vld [vmem:[#allocation6 + $0x18] sm:$0xff]  ;;  %s554_s2 = smov 32   ;;  %vm86_vm0 = vcmask 130048  }
  0x14   :  { %90 = vrot.lane.b32.xlu0 %v88_v0, %s554_s2  ;;  %140 = vmatpush.bf16.msra.mxu0 %v412_v1  ;;  %v411_v2 = vld [vmem:[#allocation6 + $0x10] sm:$0xff]  ;;  %v410_v3 = vld [vmem:[#allocation6 + $0x8] sm:$0xff]  ;;  %v409_v4 = vld [vmem:[#allocation6] sm:$0xff]  ;;  %vm93_vm1 = vcmask 261120   ;;  %vm132_vm2 = vcmask 523264  }
  0x15   :  { %v85_v5 = vld [vmem:[#allocation2] sm:$0xff]  ;;  %v195_v36 = vld [vmem:[#allocation4 + $0x8] sm:$0xff]  ;;  %v415_v38 = vld [vmem:[#allocation6 + $0x30] sm:$0xff] }
  0x16   :  { %v87_v6 = vsel %vm86_vm0, %v85_v5, 0.0  ;;  %v429_v10 = vld [vmem:[%s644_s3] ss:$0 sm:$0xff]  ;;  %v416_v37 = vld [vmem:[#allocation6 + $0x38] sm:$0xff]  ;;  %v413_v42 = vld [vmem:[#allocation6 + $0x20] sm:$0xff] }
  0x17   :  { %251 = vmatpush.bf16.msra.mxu1 %v416_v37  ;;  %v414_v39 = vld [vmem:[#allocation6 + $0x28] sm:$0xff] }
  0x18   :  { %141 = vmatpush.bf16.msra.mxu0 %v411_v2  ;;  %v430_v47 = vld [vmem:[%s644_s3 + $0x1] ss:$0 sm:$0xff]  ;;  %s555_s3 = smov 96  }
  0x1b   :  { %252 = vmatpush.bf16.msra.mxu1 %v415_v38 }
  0x1c   :  { %142 = vmatpush.bf16.msra.mxu0 %v410_v3 }
  0x1f   :  { %253 = vmatpush.bf16.msra.mxu1 %v414_v39 }
  0x20   :  { %143 = vmatpush.bf16.msra.mxu0 %v409_v4 }
  0x23   :  { %254 = vmatpush.bf16.msra.mxu1 %v413_v42 }
  0x86   :  { %v91_v7 = vpop.permute.xlu0 %90 }
  0x87   :  { %v94_v8 = vsel %vm93_vm1, %v87_v6, %v91_v7 }
  0x88   :  { %v95_v9 = vpack.c.bf16 %v94_v8, %v94_v8 }
  0x8a   :  { %379 = vmatmul.msk.bf16.vlgmr.msra.gmra.mxu0 %vm132_vm2, %v95_v9 }
 0x107   :  { %v145_v11 = vpop.f32.mrf.mxu0 }
 0x108   :  { %v146_v12 = vadd.f32 %v429_v10, %v145_v11 }
 0x10a   :  { %169 = vrot.lane.b32.xlu0 %v146_v12, %s554_s2  ;;  %v380_v14 = vmul.f32 -1.442695, %v146_v12 }
 0x10c   :  { %432 = vpow2.f32 %v380_v14 }
 0x10f   :  { %v147_v13 = vpop.f32.mrf.mxu0 }
 0x110   :  { %v417_v13 = vld [vmem:[#allocation7] sm:$0xff] }
 0x112   :  { %v433_v15 = vpop.eup %432 }
 0x113   :  { %v152_v16 = vadd.f32 1.0, %v433_v15  ;;  %v431_v15 = vld [vmem:[%s646_s5] ss:$0 sm:$0xff] }
 0x115   :  { %434 = vrcp.f32 %v152_v16  ;;  %v164_v22 = vand.u32 2147483648, %v152_v16  ;;  %vm158_vm4 = vweird.f32 %v152_v16  ;;  %v162_v23 = vand.u32 2147483647, %v152_v16 }
 0x117   :  { %v165_v25 = vor.u32 1.1754944e-38, %v164_v22  ;;  %vm163_vm6 = vcmp.eq.f32.partialorder %v162_v23, 8.507059e+37 }
 0x11b   :  { %v435_v17 = vpop.eup %434 }
 0x11c   :  { %v154_v18 = vmul.f32 %v435_v17, %v152_v16  ;;  %vm159_vm3 = vweird.f32 %v435_v17 }
 0x11d   :  { %vm160_vm5 = vmor %vm158_vm4, %vm159_vm3 }
 0x11e   :  { %v155_v19 = vsub.f32 1.0, %v154_v18 }
 0x120   :  { %v156_v20 = vmul.f32 %v435_v17, %v155_v19 }
 0x122   :  { %v157_v21 = vadd.f32 %v435_v17, %v156_v20 }
 0x124   :  { %v161_v24 = vsel %vm160_vm5, %v435_v17, %v157_v21 }
 0x125   :  { %v166_v27 = vsel %vm163_vm6, %v165_v25, %v161_v24 }
 0x17c   :  { %v170_v26 = vpop.permute.xlu0 %169 }
 0x17d   :  { %v172_v28 = vmul.f32 %v170_v26, %v166_v27 }
 0x17f   :  { %174 = vrot.lane.b32.xlu1 %v172_v28, %s551_s15 }
 0x1f1   :  { %v175_v29 = vpop.permute.xlu1 %174 }
 0x1f2   :  { %v177_v30 = vadd.f32 %v175_v29, %v146_v12  ;;  %v418_v12 = vld [vmem:[#allocation7 + $0x8] sm:$0xff] }
 0x1f3   :  { %338 = vmatpush.bf16.msra.mxu2 %v418_v12 }
 0x1f4   :  { %436 = vtanh.f32 %v177_v30 }
 0x1f7   :  { %339 = vmatpush.bf16.msra.mxu2 %v417_v13 }
 0x1fa   :  { %v437_v31 = vpop.eup %436 }
 0x1fb   :  { %180 = vrot.lane.b32.xlu1 %v437_v31, %s551_s15 }
 0x203   :  { %201 = vrot.lane.b32.xlu1 %v195_v36, %s554_s2 }
 0x26d   :  { %v181_v32 = vpop.permute.xlu1 %180 }
 0x26e   :  { %v183_v33 = vsub.f32 %v88_v0, %v181_v32 }
 0x270   :  { %185 = vrot.lane.b32.xlu2 %v183_v33, %s554_s2 }
 0x275   :  { %v202_v43 = vpop.permute.xlu1 %201 }
 0x2ca   :  { %v186_v34 = vpop.permute.xlu2 %185 }
 0x2cb   :  { %v188_v35 = vmul.f32 %v186_v34, %v166_v27 }
 0x2cd   :  { %190 = vrot.lane.b32.xlu2 %v188_v35, %s554_s2 }
 0x327   :  { %v191_v40 = vpop.permute.xlu2 %190 }
 0x328   :  { %v193_v41 = vadd.f32 %v437_v31, %v191_v40 }
 0x32a   :  { %197 = vrot.lane.b32.xlu0 %v193_v41, %s551_s15 }
 0x39c   :  { %v198_v44 = vpop.permute.xlu0 %197 }
 0x39d   :  { %v204_v45 = vsel %vm93_vm1, %v198_v44, %v202_v43 }
 0x39e   :  { %v205_v46 = vpack.c.bf16 %v204_v45, %v204_v45 }
 0x3a0   :  { %398 = vmatmul.msk.bf16.vlgmr.msra.gmra.mxu1 %vm132_vm2, %v205_v46 }
 0x41d   :  { %v256_v48 = vpop.f32.mrf.mxu1 }
 0x41e   :  { %v257_v49 = vadd.f32 %v430_v47, %v256_v48 }
 0x420   :  { %280 = vrot.lane.b32.xlu2 %v257_v49, %s554_s2  ;;  %v399_v51 = vmul.f32 -1.442695, %v257_v49 }
 0x422   :  { %438 = vpow2.f32 %v399_v51 }
 0x425   :  { %v258_v50 = vpop.f32.mrf.mxu1 }
 0x428   :  { %v439_v52 = vpop.eup %438 }
 0x429   :  { %v263_v53 = vadd.f32 1.0, %v439_v52 }
 0x42b   :  { %440 = vrcp.f32 %v263_v53  ;;  %v275_v59 = vand.u32 2147483648, %v263_v53  ;;  %vm269_vm8 = vweird.f32 %v263_v53  ;;  %v273_v60 = vand.u32 2147483647, %v263_v53 }
 0x42d   :  { %v276_v62 = vor.u32 1.1754944e-38, %v275_v59  ;;  %vm274_vm10 = vcmp.eq.f32.partialorder %v273_v60, 8.507059e+37 }
 0x431   :  { %v441_v54 = vpop.eup %440 }
 0x432   :  { %v265_v55 = vmul.f32 %v441_v54, %v263_v53  ;;  %vm270_vm7 = vweird.f32 %v441_v54 }
 0x433   :  { %vm271_vm9 = vmor %vm269_vm8, %vm270_vm7 }
 0x434   :  { %v266_v56 = vsub.f32 1.0, %v265_v55 }
 0x436   :  { %v267_v57 = vmul.f32 %v441_v54, %v266_v56 }
 0x438   :  { %v268_v58 = vadd.f32 %v441_v54, %v267_v57 }
 0x43a   :  { %v272_v61 = vsel %vm271_vm9, %v441_v54, %v268_v58 }
 0x43b   :  { %v277_v0 = vsel %vm274_vm10, %v276_v62, %v272_v61 }
 0x47a   :  { %v281_v63 = vpop.permute.xlu2 %280 }
 0x47b   :  { %v283_v1 = vmul.f32 %v281_v63, %v277_v0 }
 0x47d   :  { %285 = vrot.lane.b32.xlu0 %v283_v1, %s551_s15 }
 0x4ef   :  { %v286_v2 = vpop.permute.xlu0 %285 }
 0x4f0   :  { %v288_v3 = vadd.f32 %v286_v2, %v257_v49 }
 0x4f2   :  { %442 = vtanh.f32 %v288_v3 }
 0x4f8   :  { %v443_v4 = vpop.eup %442 }
 0x4f9   :  { %291 = vrot.lane.b32.xlu1 %v443_v4, %s551_s15 }
 0x56b   :  { %v292_v5 = vpop.permute.xlu1 %291 }
 0x56c   :  { %v294_v6 = vsub.f32 %v195_v36, %v292_v5 }
 0x56e   :  { %296 = vrot.lane.b32.xlu2 %v294_v6, %s554_s2 }
 0x5c8   :  { %v297_v7 = vpop.permute.xlu2 %296 }
 0x5c9   :  { %v299_v8 = vmul.f32 %v297_v7, %v277_v0 }
 0x5cb   :  { %301 = vrot.lane.b32.xlu0 %v299_v8, %s554_s2 }
 0x63d   :  { %v302_v9 = vpop.permute.xlu0 %301 }
 0x63e   :  { %v304_v10 = vadd.f32 %v443_v4, %v302_v9 }
 0x640   :  { %346 = vrot.lane.b32.xlu2 %v304_v10, %s555_s3  ;;  %v305_v11 = vpack.c.bf16 %v304_v10, %v304_v10 }
 0x642   :  { %315 = vrot.lane.b32.xlu1 %v305_v11, %s551_s15 }
 0x69a   :  { %v347_v19 = vpop.permute.xlu2 %346 }
 0x69b   :  { %v353_v20 = vsel %vm93_vm1, %v198_v44, %v347_v19 }
 0x6b4   :  { %v316_v14 = vpop.permute.xlu1 %315 }
 0x6b5   :  { %408 = vmatmul.msk.bf16.vlgmr.msra.gmra.mxu2 %vm93_vm1, %v316_v14 }
 0x738   :  { %v341_v16 = vpop.f32.mrf.mxu2 }
 0x739   :  { %v342_v17 = vadd.f32 %v431_v15, %v341_v16 }
 0x73b   :  { %350 = vrot.lane.b32.xlu0 %v342_v17, %s551_s15 }
 0x740   :  { %v343_v18 = vpop.f32.mrf.mxu2 }
 0x7ad   :  { %v351_v21 = vpop.permute.xlu0 %350 }
 0x7ae   :  { %v354_v22 = vsel %vm132_vm2, %v353_v20, %v351_v21 }
 0x7af   :  { %355 = vst [vmem:[%s647_s6] sm:$0xff] %v354_v22 }
 0x7b0   :  { %360 = vsyncpa [#allocation3], 1 }
 0x7b1   :  { %361 = vsyncpa [#allocation5], 1 }
 0x7b2   :  { %362 = vsyncpa [#allocation8], 1 }

</bundles_post_ra>
